<compile_context>
chip_gen: v5e
topology: v5e:2x2
jax: 0.10.0
libtpu: 0.0.40
codegen_flags: <defaults>
</compile_context>

<pallas_src>
import functools

import jax
import jax.numpy as jnp
from jax.experimental import pallas as pl
from jax.experimental.pallas import tpu as pltpu


# ---------------------------------------------------------------------------
# Pallas kernel: one grid step == one chunk of Tc timesteps of the GRU recurrence.
#   gx_ref  : (Tc, B, 3H)  precomputed input projection (+ folded biases), time-major
#   whh_ref : (H, 3H)      recurrent weights, resident across the whole grid
#   bhn_ref : (1, H)       b_hh of the candidate gate (the only bias left per step)
#   y_ref   : (Tc, B, H)   output chunk (time-major)
#   hn_ref  : (B, H)       resident hidden-state accumulator == final h_n
# ---------------------------------------------------------------------------
def _gru_chunk_kernel(gx_ref, whh_ref, bhn_ref, y_ref, hn_ref, *, Tc, H):
    c = pl.program_id(0)

    @pl.when(c == 0)
    def _():
        # matches RNN.init_hidden: h_0 = zeros
        hn_ref[...] = jnp.zeros_like(hn_ref)

    whh = whh_ref[...]          # (H, 3H), stays resident in VMEM
    bhn = bhn_ref[...]          # (1, H)
    h = hn_ref[...]             # (B, H) carried in vregs across the unrolled chunk

    # Fully unrolled inner loop with static indices (straight-line code for the
    # LLO scheduler; Tc is small so vreg pressure is negligible).
    for i in range(Tc):
        gx = gx_ref[i]          # (B, 3H): r|z|n input pre-activations (+ folded biases)
        gh = jnp.dot(h, whh, preferred_element_type=jnp.float32)   # (B, 3H)

        # PyTorch GRU gate ordering: r, z, n.  b_hh_r / b_hh_z already folded into gx.
        r = jax.nn.sigmoid(gx[:, 0:H] + gh[:, 0:H])
        z = jax.nn.sigmoid(gx[:, H:2 * H] + gh[:, H:2 * H])
        n = jnp.tanh(gx[:, 2 * H:] + r * (gh[:, 2 * H:] + bhn))
        h = (1.0 - z) * n + z * h

        y_ref[i] = h.astype(y_ref.dtype)

    hn_ref[...] = h             # single state writeback per chunk (final chunk == h_n)


def gru_forward_pallas(x_emb_btE, w_ih, w_hh, b_ih, b_hh, *, target_chunk=16):
    """x_emb_btE: (B, T, E) float32 (batch_first). Weights in PyTorch layout:
    w_ih (3H, E), w_hh (3H, H), b_ih (3H,), b_hh (3H,).
    Returns y (B, T, H), h_n (1, B, H)."""
    B, T, E = x_emb_btE.shape
    H = w_hh.shape[1]
    G = 3 * H

    # Time-chunk size: largest divisor of T not exceeding target_chunk.
    Tc = 1
    for d in range(min(T, target_chunk), 0, -1):
        if T % d == 0:
            Tc = d
            break
    num_chunks = T // Tc

    wih_t = jnp.transpose(w_ih)                     # (E, 3H)
    whh_t = jnp.transpose(w_hh)                     # (H, 3H)

    # Bias folding: b_ih (all gates) + b_hh_{r,z} are state-independent -> into gx.
    bias_fold = jnp.concatenate(
        [b_ih[:H] + b_hh[:H],
         b_ih[H:2 * H] + b_hh[H:2 * H],
         b_ih[2 * H:]]).reshape(1, 1, G)
    b_hh_n = b_hh[2 * H:].reshape(1, H)

    # Hoisted input projection for ALL timesteps as one big batched matmul, fused with
    # the (B,T,E) -> (T,B,3H) permute (no separate full-tensor transpose pass).
    gx = jnp.einsum('bte,eg->tbg', x_emb_btE, wih_t) + bias_fold     # (T, B, 3H) f32

    kernel = functools.partial(_gru_chunk_kernel, Tc=Tc, H=H)

    y_tbH, h_n = pl.pallas_call(
        kernel,
        out_shape=(
            jax.ShapeDtypeStruct((T, B, H), jnp.float32),
            jax.ShapeDtypeStruct((B, H), jnp.float32),
        ),
        grid_spec=pltpu.PrefetchScalarGridSpec(
            num_scalar_prefetch=0,
            grid=(num_chunks,),
            in_specs=[
                pl.BlockSpec((Tc, B, G), lambda c: (c, 0, 0)),   # gx chunk
                pl.BlockSpec((H, G), lambda c: (0, 0)),          # W_hh^T (resident)
                pl.BlockSpec((1, H), lambda c: (0, 0)),          # b_hh_n (resident)
            ],
            out_specs=[
                pl.BlockSpec((Tc, B, H), lambda c: (c, 0, 0)),   # y chunk
                pl.BlockSpec((B, H), lambda c: (0, 0)),          # h_n (resident state)
            ],
        ),
        compiler_params=pltpu.CompilerParams(
            dimension_semantics=("arbitrary",),                  # sequential recurrence
        ),
    )(gx, whh_t, b_hh_n)

    # Back to PyTorch's batch_first output convention (review: time-major internally,
    # single transpose at the boundary / fuse into the consumer).
    y_btH = jnp.transpose(y_tbH, (1, 0, 2))
    return y_btH, h_n[None, :, :]                                # (B,T,H), (1,B,H)


# ---------------------------------------------------------------------------
# Pure-JAX reference (mirrors torch.nn.GRU, batch_first) for verification.
# ---------------------------------------------------------------------------
def gru_forward_ref(x_emb_btE, w_ih, w_hh, b_ih, b_hh):
    B, T, E = x_emb_btE.shape
    H = w_hh.shape[1]

    def step(h, x_t):
        gx = x_t @ w_ih.T + b_ih
        gh = h @ w_hh.T + b_hh
        r = jax.nn.sigmoid(gx[:, :H] + gh[:, :H])
        z = jax.nn.sigmoid(gx[:, H:2 * H] + gh[:, H:2 * H])
        n = jnp.tanh(gx[:, 2 * H:] + r * gh[:, 2 * H:])
        h_new = (1.0 - z) * n + z * h
        return h_new, h_new

    h0 = jnp.zeros((B, H), jnp.float32)
    h_last, ys = jax.lax.scan(step, h0, jnp.transpose(x_emb_btE, (1, 0, 2)))
    return jnp.transpose(ys, (1, 0, 2)), h_last[None]


# ---------------------------------------------------------------------------
# Module wrapper: embedding (glue, plain JAX gather) + Pallas GRU.
# ---------------------------------------------------------------------------
class RNNPallas:
    def __init__(self, input_size, hidden_size, nlayers, embed_dim, rnn_type,
                 pad_idx, dropout, bidirect, key):
        assert rnn_type == "GRU", "only GRU implemented"
        assert nlayers == 1 and not bidirect
        # TODO(synk): multi-layer / bidirectional / LSTM variants and dropout not implemented.
        self.hidden_size = hidden_size
        H = hidden_size
        k_emb, k_ih, k_hh, k_bih, k_bhh = jax.random.split(key, 5)
        emb = jax.random.uniform(k_emb, (input_size, embed_dim), jnp.float32, -0.05, 0.05)
        self.embedding = emb.at[pad_idx].set(0.0)          # padding_idx row is zero
        s = 1.0 / jnp.sqrt(H)
        self.w_ih = jax.random.uniform(k_ih, (3 * H, embed_dim), jnp.float32, -s, s)
        self.w_hh = jax.random.uniform(k_hh, (3 * H, H), jnp.float32, -s, s)
        self.b_ih = jax.random.uniform(k_bih, (3 * H,), jnp.float32, -s, s)
        self.b_hh = jax.random.uniform(k_bhh, (3 * H,), jnp.float32, -s, s)

    def forward(self, tokens):
        x_emb = jnp.take(self.embedding, tokens, axis=0)   # (B, T, E) — glue gather
        return gru_forward_pallas(x_emb, self.w_ih, self.w_hh, self.b_ih, self.b_hh)

    def forward_ref(self, tokens):
        x_emb = jnp.take(self.embedding, tokens, axis=0)
        return gru_forward_ref(x_emb, self.w_ih, self.w_hh, self.b_ih, self.b_hh)


if __name__ == "__main__":
    # Small shapes consistent with the module
    VOCAB, HIDDEN, NLAYERS, EMBED = 16, 32, 1, 32
    PAD_IDX = 0
    B, T = 2, 8

    key = jax.random.PRNGKey(0)
    k_model, k_tok = jax.random.split(key)
    model = RNNPallas(VOCAB, HIDDEN, NLAYERS, EMBED, "GRU", PAD_IDX,
                      dropout=0.0, bidirect=False, key=k_model)

    tokens = jax.random.randint(k_tok, (B, T), 0, VOCAB, dtype=jnp.int32)

    y, h_n = model.forward(tokens)
    y = jax.block_until_ready(y)
    h_n = jax.block_until_ready(h_n)

    y_ref, h_ref = model.forward_ref(tokens)
    assert y.shape == (B, T, HIDDEN) and h_n.shape == (1, B, HIDDEN)
    assert jnp.allclose(y, y_ref, atol=1e-4, rtol=1e-4)
    assert jnp.allclose(h_n, h_ref, atol=1e-4, rtol=1e-4)

    print("KERNEL_OK")
</pallas_src>

<mosaic_0001>
module attributes {stable_mosaic.version = 11 : i64} {
  func.func @_gru_chunk_kernel(%arg0: i32, %arg1: memref<8x2x96xf32, #tpu.memory_space<vmem>>, %arg2: memref<32x96xf32, #tpu.memory_space<vmem>>, %arg3: memref<1x32xf32, #tpu.memory_space<vmem>>, %arg4: memref<8x2x32xf32, #tpu.memory_space<vmem>>, %arg5: memref<2x32xf32, #tpu.memory_space<vmem>>) attributes {dimension_semantics = [#tpu.dimension_semantics<arbitrary>], iteration_bounds = array<i64: 1>, scalar_prefetch = 0 : i64, scratch_operands = 0 : i64, tpu.core_type = #tpu.core_type<tc>, window_params = [{transform_indices = @transform_0, window_bounds = array<i64: 8, 2, 96>}, {pipeline_mode = #tpu.pipeline_mode<synchronous>, transform_indices = @transform_1, window_bounds = array<i64: 32, 96>}, {pipeline_mode = #tpu.pipeline_mode<synchronous>, transform_indices = @transform_2, window_bounds = array<i64: 1, 32>}, {transform_indices = @transform_3, window_bounds = array<i64: 8, 2, 32>}, {pipeline_mode = #tpu.pipeline_mode<synchronous>, transform_indices = @transform_4, window_bounds = array<i64: 2, 32>}]} {
    %c0_i32 = arith.constant 0 : i32
    %0 = arith.cmpi eq, %arg0, %c0_i32 : i32
    %1 = arith.extui %0 : i1 to i32
    %c0_i32_0 = arith.constant 0 : i32
    %2 = arith.cmpi ne, %1, %c0_i32_0 : i32
    scf.if %2 {
      %cst_80 = arith.constant 0.000000e+00 : f32
      %279 = vector.broadcast %cst_80 : f32 to vector<2x32xf32>
      %c0_81 = arith.constant 0 : index
      %c0_82 = arith.constant 0 : index
      %280 = vector.load %arg5[%c0_81, %c0_82] : memref<2x32xf32, #tpu.memory_space<vmem>>, vector<2x32xf32>
      tpu.vector_store %arg5[%c0_81, %c0_82], %279 {strides = array<i32>} : memref<2x32xf32, #tpu.memory_space<vmem>>, vector<2x32xf32>,
    } else {
    }
    %c0 = arith.constant 0 : index
    %c0_1 = arith.constant 0 : index
    %3 = vector.load %arg2[%c0, %c0_1] : memref<32x96xf32, #tpu.memory_space<vmem>>, vector<32x96xf32>
    %c0_2 = arith.constant 0 : index
    %c0_3 = arith.constant 0 : index
    %4 = vector.load %arg3[%c0_2, %c0_3] : memref<1x32xf32, #tpu.memory_space<vmem>>, vector<1x32xf32>
    %c0_4 = arith.constant 0 : index
    %c0_5 = arith.constant 0 : index
    %5 = vector.load %arg5[%c0_4, %c0_5] : memref<2x32xf32, #tpu.memory_space<vmem>>, vector<2x32xf32>
    %c0_6 = arith.constant 0 : index
    %c0_7 = arith.constant 0 : index
    %c0_8 = arith.constant 0 : index
    %6 = vector.load %arg1[%c0_6, %c0_7, %c0_8] : memref<8x2x96xf32, #tpu.memory_space<vmem>>, vector<1x2x96xf32>
    %7 = vector.shape_cast %6 : vector<1x2x96xf32> to vector<2x96xf32>
    %cst = arith.constant dense<0.000000e+00> : vector<2x96xf32>
    %8 = tpu.matmul %5, %3, %cst {dimension_numbers = #tpu.dot_dimension_numbers<[1], [0], [0], [1], [0, 0, 1, 1], [], []>} : vector<2x32xf32>, vector<32x96xf32>, vector<2x96xf32> -> vector<2x96xf32>
    %9 = vector.extract_strided_slice %7 {offsets = [0, 0], sizes = [2, 32], strides = [1, 1]} : vector<2x96xf32> to vector<2x32xf32>
    %10 = vector.extract_strided_slice %8 {offsets = [0, 0], sizes = [2, 32], strides = [1, 1]} : vector<2x96xf32> to vector<2x32xf32>
    %11 = arith.addf %9, %10 : vector<2x32xf32>
    %12 = arith.negf %11 : vector<2x32xf32>
    %13 = math.exp %12 : vector<2x32xf32>
    %cst_9 = arith.constant 1.000000e+00 : f32
    %14 = vector.broadcast %cst_9 : f32 to vector<2x32xf32>
    %15 = arith.addf %14, %13 : vector<2x32xf32>
    %16 = arith.divf %14, %15 : vector<2x32xf32>
    %17 = vector.extract_strided_slice %7 {offsets = [0, 32], sizes = [2, 32], strides = [1, 1]} : vector<2x96xf32> to vector<2x32xf32>
    %18 = vector.extract_strided_slice %8 {offsets = [0, 32], sizes = [2, 32], strides = [1, 1]} : vector<2x96xf32> to vector<2x32xf32>
    %19 = arith.addf %17, %18 : vector<2x32xf32>
    %20 = arith.negf %19 : vector<2x32xf32>
    %21 = math.exp %20 : vector<2x32xf32>
    %cst_10 = arith.constant 1.000000e+00 : f32
    %22 = vector.broadcast %cst_10 : f32 to vector<2x32xf32>
    %23 = arith.addf %22, %21 : vector<2x32xf32>
    %24 = arith.divf %22, %23 : vector<2x32xf32>
    %25 = vector.extract_strided_slice %7 {offsets = [0, 64], sizes = [2, 32], strides = [1, 1]} : vector<2x96xf32> to vector<2x32xf32>
    %26 = vector.extract_strided_slice %8 {offsets = [0, 64], sizes = [2, 32], strides = [1, 1]} : vector<2x96xf32> to vector<2x32xf32>
    %27 = vector.broadcast %4 : vector<1x32xf32> to vector<2x32xf32>
    %28 = arith.addf %26, %27 : vector<2x32xf32>
    %29 = arith.mulf %16, %28 : vector<2x32xf32>
    %30 = arith.addf %25, %29 : vector<2x32xf32>
    %31 = math.tanh %30 : vector<2x32xf32>
    %cst_11 = arith.constant 1.000000e+00 : f32
    %32 = vector.broadcast %cst_11 : f32 to vector<2x32xf32>
    %33 = arith.subf %32, %24 : vector<2x32xf32>
    %34 = arith.mulf %33, %31 : vector<2x32xf32>
    %35 = arith.mulf %24, %5 : vector<2x32xf32>
    %36 = arith.addf %34, %35 : vector<2x32xf32>
    %c0_12 = arith.constant 0 : index
    %c0_13 = arith.constant 0 : index
    %c0_14 = arith.constant 0 : index
    %37 = vector.load %arg4[%c0_12, %c0_13, %c0_14] : memref<8x2x32xf32, #tpu.memory_space<vmem>>, vector<1x2x32xf32>
    %38 = vector.shape_cast %37 : vector<1x2x32xf32> to vector<2x32xf32>
    %39 = vector.shape_cast %36 : vector<2x32xf32> to vector<1x2x32xf32>
    tpu.vector_store %arg4[%c0_12, %c0_13, %c0_14], %39 {strides = array<i32>} : memref<8x2x32xf32, #tpu.memory_space<vmem>>, vector<1x2x32xf32>,
    %c1 = arith.constant 1 : index
    %c0_15 = arith.constant 0 : index
    %c0_16 = arith.constant 0 : index
    %40 = vector.load %arg1[%c1, %c0_15, %c0_16] : memref<8x2x96xf32, #tpu.memory_space<vmem>>, vector<1x2x96xf32>
    %41 = vector.shape_cast %40 : vector<1x2x96xf32> to vector<2x96xf32>
    %cst_17 = arith.constant dense<0.000000e+00> : vector<2x96xf32>
    %42 = tpu.matmul %36, %3, %cst_17 {dimension_numbers = #tpu.dot_dimension_numbers<[1], [0], [0], [1], [0, 0, 1, 1], [], []>} : vector<2x32xf32>, vector<32x96xf32>, vector<2x96xf32> -> vector<2x96xf32>
    %43 = vector.extract_strided_slice %41 {offsets = [0, 0], sizes = [2, 32], strides = [1, 1]} : vector<2x96xf32> to vector<2x32xf32>
    %44 = vector.extract_strided_slice %42 {offsets = [0, 0], sizes = [2, 32], strides = [1, 1]} : vector<2x96xf32> to vector<2x32xf32>
    %45 = arith.addf %43, %44 : vector<2x32xf32>
    %46 = arith.negf %45 : vector<2x32xf32>
    %47 = math.exp %46 : vector<2x32xf32>
    %cst_18 = arith.constant 1.000000e+00 : f32
    %48 = vector.broadcast %cst_18 : f32 to vector<2x32xf32>
    %49 = arith.addf %48, %47 : vector<2x32xf32>
    %50 = arith.divf %48, %49 : vector<2x32xf32>
    %51 = vector.extract_strided_slice %41 {offsets = [0, 32], sizes = [2, 32], strides = [1, 1]} : vector<2x96xf32> to vector<2x32xf32>
    %52 = vector.extract_strided_slice %42 {offsets = [0, 32], sizes = [2, 32], strides = [1, 1]} : vector<2x96xf32> to vector<2x32xf32>
    %53 = arith.addf %51, %52 : vector<2x32xf32>
    %54 = arith.negf %53 : vector<2x32xf32>
    %55 = math.exp %54 : vector<2x32xf32>
    %cst_19 = arith.constant 1.000000e+00 : f32
    %56 = vector.broadcast %cst_19 : f32 to vector<2x32xf32>
    %57 = arith.addf %56, %55 : vector<2x32xf32>
    %58 = arith.divf %56, %57 : vector<2x32xf32>
    %59 = vector.extract_strided_slice %41 {offsets = [0, 64], sizes = [2, 32], strides = [1, 1]} : vector<2x96xf32> to vector<2x32xf32>
    %60 = vector.extract_strided_slice %42 {offsets = [0, 64], sizes = [2, 32], strides = [1, 1]} : vector<2x96xf32> to vector<2x32xf32>
    %61 = vector.broadcast %4 : vector<1x32xf32> to vector<2x32xf32>
    %62 = arith.addf %60, %61 : vector<2x32xf32>
    %63 = arith.mulf %50, %62 : vector<2x32xf32>
    %64 = arith.addf %59, %63 : vector<2x32xf32>
    %65 = math.tanh %64 : vector<2x32xf32>
    %cst_20 = arith.constant 1.000000e+00 : f32
    %66 = vector.broadcast %cst_20 : f32 to vector<2x32xf32>
    %67 = arith.subf %66, %58 : vector<2x32xf32>
    %68 = arith.mulf %67, %65 : vector<2x32xf32>
    %69 = arith.mulf %58, %36 : vector<2x32xf32>
    %70 = arith.addf %68, %69 : vector<2x32xf32>
    %c1_21 = arith.constant 1 : index
    %c0_22 = arith.constant 0 : index
    %c0_23 = arith.constant 0 : index
    %71 = vector.load %arg4[%c1_21, %c0_22, %c0_23] : memref<8x2x32xf32, #tpu.memory_space<vmem>>, vector<1x2x32xf32>
    %72 = vector.shape_cast %71 : vector<1x2x32xf32> to vector<2x32xf32>
    %73 = vector.shape_cast %70 : vector<2x32xf32> to vector<1x2x32xf32>
    tpu.vector_store %arg4[%c1_21, %c0_22, %c0_23], %73 {strides = array<i32>} : memref<8x2x32xf32, #tpu.memory_space<vmem>>, vector<1x2x32xf32>,
    %c2 = arith.constant 2 : index
    %c0_24 = arith.constant 0 : index
    %c0_25 = arith.constant 0 : index
    %74 = vector.load %arg1[%c2, %c0_24, %c0_25] : memref<8x2x96xf32, #tpu.memory_space<vmem>>, vector<1x2x96xf32>
    %75 = vector.shape_cast %74 : vector<1x2x96xf32> to vector<2x96xf32>
    %cst_26 = arith.constant dense<0.000000e+00> : vector<2x96xf32>
    %76 = tpu.matmul %70, %3, %cst_26 {dimension_numbers = #tpu.dot_dimension_numbers<[1], [0], [0], [1], [0, 0, 1, 1], [], []>} : vector<2x32xf32>, vector<32x96xf32>, vector<2x96xf32> -> vector<2x96xf32>
    %77 = vector.extract_strided_slice %75 {offsets = [0, 0], sizes = [2, 32], strides = [1, 1]} : vector<2x96xf32> to vector<2x32xf32>
    %78 = vector.extract_strided_slice %76 {offsets = [0, 0], sizes = [2, 32], strides = [1, 1]} : vector<2x96xf32> to vector<2x32xf32>
    %79 = arith.addf %77, %78 : vector<2x32xf32>
    %80 = arith.negf %79 : vector<2x32xf32>
    %81 = math.exp %80 : vector<2x32xf32>
    %cst_27 = arith.constant 1.000000e+00 : f32
    %82 = vector.broadcast %cst_27 : f32 to vector<2x32xf32>
    %83 = arith.addf %82, %81 : vector<2x32xf32>
    %84 = arith.divf %82, %83 : vector<2x32xf32>
    %85 = vector.extract_strided_slice %75 {offsets = [0, 32], sizes = [2, 32], strides = [1, 1]} : vector<2x96xf32> to vector<2x32xf32>
    %86 = vector.extract_strided_slice %76 {offsets = [0, 32], sizes = [2, 32], strides = [1, 1]} : vector<2x96xf32> to vector<2x32xf32>
    %87 = arith.addf %85, %86 : vector<2x32xf32>
    %88 = arith.negf %87 : vector<2x32xf32>
    %89 = math.exp %88 : vector<2x32xf32>
    %cst_28 = arith.constant 1.000000e+00 : f32
    %90 = vector.broadcast %cst_28 : f32 to vector<2x32xf32>
    %91 = arith.addf %90, %89 : vector<2x32xf32>
    %92 = arith.divf %90, %91 : vector<2x32xf32>
    %93 = vector.extract_strided_slice %75 {offsets = [0, 64], sizes = [2, 32], strides = [1, 1]} : vector<2x96xf32> to vector<2x32xf32>
    %94 = vector.extract_strided_slice %76 {offsets = [0, 64], sizes = [2, 32], strides = [1, 1]} : vector<2x96xf32> to vector<2x32xf32>
    %95 = vector.broadcast %4 : vector<1x32xf32> to vector<2x32xf32>
    %96 = arith.addf %94, %95 : vector<2x32xf32>
    %97 = arith.mulf %84, %96 : vector<2x32xf32>
    %98 = arith.addf %93, %97 : vector<2x32xf32>
    %99 = math.tanh %98 : vector<2x32xf32>
    %cst_29 = arith.constant 1.000000e+00 : f32
    %100 = vector.broadcast %cst_29 : f32 to vector<2x32xf32>
    %101 = arith.subf %100, %92 : vector<2x32xf32>
    %102 = arith.mulf %101, %99 : vector<2x32xf32>
    %103 = arith.mulf %92, %70 : vector<2x32xf32>
    %104 = arith.addf %102, %103 : vector<2x32xf32>
    %c2_30 = arith.constant 2 : index
    %c0_31 = arith.constant 0 : index
    %c0_32 = arith.constant 0 : index
    %105 = vector.load %arg4[%c2_30, %c0_31, %c0_32] : memref<8x2x32xf32, #tpu.memory_space<vmem>>, vector<1x2x32xf32>
    %106 = vector.shape_cast %105 : vector<1x2x32xf32> to vector<2x32xf32>
    %107 = vector.shape_cast %104 : vector<2x32xf32> to vector<1x2x32xf32>
    tpu.vector_store %arg4[%c2_30, %c0_31, %c0_32], %107 {strides = array<i32>} : memref<8x2x32xf32, #tpu.memory_space<vmem>>, vector<1x2x32xf32>,
    %c3 = arith.constant 3 : index
    %c0_33 = arith.constant 0 : index
    %c0_34 = arith.constant 0 : index
    %108 = vector.load %arg1[%c3, %c0_33, %c0_34] : memref<8x2x96xf32, #tpu.memory_space<vmem>>, vector<1x2x96xf32>
    %109 = vector.shape_cast %108 : vector<1x2x96xf32> to vector<2x96xf32>
    %cst_35 = arith.constant dense<0.000000e+00> : vector<2x96xf32>
    %110 = tpu.matmul %104, %3, %cst_35 {dimension_numbers = #tpu.dot_dimension_numbers<[1], [0], [0], [1], [0, 0, 1, 1], [], []>} : vector<2x32xf32>, vector<32x96xf32>, vector<2x96xf32> -> vector<2x96xf32>
    %111 = vector.extract_strided_slice %109 {offsets = [0, 0], sizes = [2, 32], strides = [1, 1]} : vector<2x96xf32> to vector<2x32xf32>
    %112 = vector.extract_strided_slice %110 {offsets = [0, 0], sizes = [2, 32], strides = [1, 1]} : vector<2x96xf32> to vector<2x32xf32>
    %113 = arith.addf %111, %112 : vector<2x32xf32>
    %114 = arith.negf %113 : vector<2x32xf32>
    %115 = math.exp %114 : vector<2x32xf32>
    %cst_36 = arith.constant 1.000000e+00 : f32
    %116 = vector.broadcast %cst_36 : f32 to vector<2x32xf32>
    %117 = arith.addf %116, %115 : vector<2x32xf32>
    %118 = arith.divf %116, %117 : vector<2x32xf32>
    %119 = vector.extract_strided_slice %109 {offsets = [0, 32], sizes = [2, 32], strides = [1, 1]} : vector<2x96xf32> to vector<2x32xf32>
    %120 = vector.extract_strided_slice %110 {offsets = [0, 32], sizes = [2, 32], strides = [1, 1]} : vector<2x96xf32> to vector<2x32xf32>
    %121 = arith.addf %119, %120 : vector<2x32xf32>
    %122 = arith.negf %121 : vector<2x32xf32>
    %123 = math.exp %122 : vector<2x32xf32>
    %cst_37 = arith.constant 1.000000e+00 : f32
    %124 = vector.broadcast %cst_37 : f32 to vector<2x32xf32>
    %125 = arith.addf %124, %123 : vector<2x32xf32>
    %126 = arith.divf %124, %125 : vector<2x32xf32>
    %127 = vector.extract_strided_slice %109 {offsets = [0, 64], sizes = [2, 32], strides = [1, 1]} : vector<2x96xf32> to vector<2x32xf32>
    %128 = vector.extract_strided_slice %110 {offsets = [0, 64], sizes = [2, 32], strides = [1, 1]} : vector<2x96xf32> to vector<2x32xf32>
    %129 = vector.broadcast %4 : vector<1x32xf32> to vector<2x32xf32>
    %130 = arith.addf %128, %129 : vector<2x32xf32>
    %131 = arith.mulf %118, %130 : vector<2x32xf32>
    %132 = arith.addf %127, %131 : vector<2x32xf32>
    %133 = math.tanh %132 : vector<2x32xf32>
    %cst_38 = arith.constant 1.000000e+00 : f32
    %134 = vector.broadcast %cst_38 : f32 to vector<2x32xf32>
    %135 = arith.subf %134, %126 : vector<2x32xf32>
    %136 = arith.mulf %135, %133 : vector<2x32xf32>
    %137 = arith.mulf %126, %104 : vector<2x32xf32>
    %138 = arith.addf %136, %137 : vector<2x32xf32>
    %c3_39 = arith.constant 3 : index
    %c0_40 = arith.constant 0 : index
    %c0_41 = arith.constant 0 : index
    %139 = vector.load %arg4[%c3_39, %c0_40, %c0_41] : memref<8x2x32xf32, #tpu.memory_space<vmem>>, vector<1x2x32xf32>
    %140 = vector.shape_cast %139 : vector<1x2x32xf32> to vector<2x32xf32>
    %141 = vector.shape_cast %138 : vector<2x32xf32> to vector<1x2x32xf32>
    tpu.vector_store %arg4[%c3_39, %c0_40, %c0_41], %141 {strides = array<i32>} : memref<8x2x32xf32, #tpu.memory_space<vmem>>, vector<1x2x32xf32>,
    %c4 = arith.constant 4 : index
    %c0_42 = arith.constant 0 : index
    %c0_43 = arith.constant 0 : index
    %142 = vector.load %arg1[%c4, %c0_42, %c0_43] : memref<8x2x96xf32, #tpu.memory_space<vmem>>, vector<1x2x96xf32>
    %143 = vector.shape_cast %142 : vector<1x2x96xf32> to vector<2x96xf32>
    %cst_44 = arith.constant dense<0.000000e+00> : vector<2x96xf32>
    %144 = tpu.matmul %138, %3, %cst_44 {dimension_numbers = #tpu.dot_dimension_numbers<[1], [0], [0], [1], [0, 0, 1, 1], [], []>} : vector<2x32xf32>, vector<32x96xf32>, vector<2x96xf32> -> vector<2x96xf32>
    %145 = vector.extract_strided_slice %143 {offsets = [0, 0], sizes = [2, 32], strides = [1, 1]} : vector<2x96xf32> to vector<2x32xf32>
    %146 = vector.extract_strided_slice %144 {offsets = [0, 0], sizes = [2, 32], strides = [1, 1]} : vector<2x96xf32> to vector<2x32xf32>
    %147 = arith.addf %145, %146 : vector<2x32xf32>
    %148 = arith.negf %147 : vector<2x32xf32>
    %149 = math.exp %148 : vector<2x32xf32>
    %cst_45 = arith.constant 1.000000e+00 : f32
    %150 = vector.broadcast %cst_45 : f32 to vector<2x32xf32>
    %151 = arith.addf %150, %149 : vector<2x32xf32>
    %152 = arith.divf %150, %151 : vector<2x32xf32>
    %153 = vector.extract_strided_slice %143 {offsets = [0, 32], sizes = [2, 32], strides = [1, 1]} : vector<2x96xf32> to vector<2x32xf32>
    %154 = vector.extract_strided_slice %144 {offsets = [0, 32], sizes = [2, 32], strides = [1, 1]} : vector<2x96xf32> to vector<2x32xf32>
    %155 = arith.addf %153, %154 : vector<2x32xf32>
    %156 = arith.negf %155 : vector<2x32xf32>
    %157 = math.exp %156 : vector<2x32xf32>
    %cst_46 = arith.constant 1.000000e+00 : f32
    %158 = vector.broadcast %cst_46 : f32 to vector<2x32xf32>
    %159 = arith.addf %158, %157 : vector<2x32xf32>
    %160 = arith.divf %158, %159 : vector<2x32xf32>
    %161 = vector.extract_strided_slice %143 {offsets = [0, 64], sizes = [2, 32], strides = [1, 1]} : vector<2x96xf32> to vector<2x32xf32>
    %162 = vector.extract_strided_slice %144 {offsets = [0, 64], sizes = [2, 32], strides = [1, 1]} : vector<2x96xf32> to vector<2x32xf32>
    %163 = vector.broadcast %4 : vector<1x32xf32> to vector<2x32xf32>
    %164 = arith.addf %162, %163 : vector<2x32xf32>
    %165 = arith.mulf %152, %164 : vector<2x32xf32>
    %166 = arith.addf %161, %165 : vector<2x32xf32>
    %167 = math.tanh %166 : vector<2x32xf32>
    %cst_47 = arith.constant 1.000000e+00 : f32
    %168 = vector.broadcast %cst_47 : f32 to vector<2x32xf32>
    %169 = arith.subf %168, %160 : vector<2x32xf32>
    %170 = arith.mulf %169, %167 : vector<2x32xf32>
    %171 = arith.mulf %160, %138 : vector<2x32xf32>
    %172 = arith.addf %170, %171 : vector<2x32xf32>
    %c4_48 = arith.constant 4 : index
    %c0_49 = arith.constant 0 : index
    %c0_50 = arith.constant 0 : index
    %173 = vector.load %arg4[%c4_48, %c0_49, %c0_50] : memref<8x2x32xf32, #tpu.memory_space<vmem>>, vector<1x2x32xf32>
    %174 = vector.shape_cast %173 : vector<1x2x32xf32> to vector<2x32xf32>
    %175 = vector.shape_cast %172 : vector<2x32xf32> to vector<1x2x32xf32>
    tpu.vector_store %arg4[%c4_48, %c0_49, %c0_50], %175 {strides = array<i32>} : memref<8x2x32xf32, #tpu.memory_space<vmem>>, vector<1x2x32xf32>,
    %c5 = arith.constant 5 : index
    %c0_51 = arith.constant 0 : index
    %c0_52 = arith.constant 0 : index
    %176 = vector.load %arg1[%c5, %c0_51, %c0_52] : memref<8x2x96xf32, #tpu.memory_space<vmem>>, vector<1x2x96xf32>
    %177 = vector.shape_cast %176 : vector<1x2x96xf32> to vector<2x96xf32>
    %cst_53 = arith.constant dense<0.000000e+00> : vector<2x96xf32>
    %178 = tpu.matmul %172, %3, %cst_53 {dimension_numbers = #tpu.dot_dimension_numbers<[1], [0], [0], [1], [0, 0, 1, 1], [], []>} : vector<2x32xf32>, vector<32x96xf32>, vector<2x96xf32> -> vector<2x96xf32>
    %179 = vector.extract_strided_slice %177 {offsets = [0, 0], sizes = [2, 32], strides = [1, 1]} : vector<2x96xf32> to vector<2x32xf32>
    %180 = vector.extract_strided_slice %178 {offsets = [0, 0], sizes = [2, 32], strides = [1, 1]} : vector<2x96xf32> to vector<2x32xf32>
    %181 = arith.addf %179, %180 : vector<2x32xf32>
    %182 = arith.negf %181 : vector<2x32xf32>
    %183 = math.exp %182 : vector<2x32xf32>
    %cst_54 = arith.constant 1.000000e+00 : f32
    %184 = vector.broadcast %cst_54 : f32 to vector<2x32xf32>
    %185 = arith.addf %184, %183 : vector<2x32xf32>
    %186 = arith.divf %184, %185 : vector<2x32xf32>
    %187 = vector.extract_strided_slice %177 {offsets = [0, 32], sizes = [2, 32], strides = [1, 1]} : vector<2x96xf32> to vector<2x32xf32>
    %188 = vector.extract_strided_slice %178 {offsets = [0, 32], sizes = [2, 32], strides = [1, 1]} : vector<2x96xf32> to vector<2x32xf32>
    %189 = arith.addf %187, %188 : vector<2x32xf32>
    %190 = arith.negf %189 : vector<2x32xf32>
    %191 = math.exp %190 : vector<2x32xf32>
    %cst_55 = arith.constant 1.000000e+00 : f32
    %192 = vector.broadcast %cst_55 : f32 to vector<2x32xf32>
    %193 = arith.addf %192, %191 : vector<2x32xf32>
    %194 = arith.divf %192, %193 : vector<2x32xf32>
    %195 = vector.extract_strided_slice %177 {offsets = [0, 64], sizes = [2, 32], strides = [1, 1]} : vector<2x96xf32> to vector<2x32xf32>
    %196 = vector.extract_strided_slice %178 {offsets = [0, 64], sizes = [2, 32], strides = [1, 1]} : vector<2x96xf32> to vector<2x32xf32>
    %197 = vector.broadcast %4 : vector<1x32xf32> to vector<2x32xf32>
    %198 = arith.addf %196, %197 : vector<2x32xf32>
    %199 = arith.mulf %186, %198 : vector<2x32xf32>
    %200 = arith.addf %195, %199 : vector<2x32xf32>
    %201 = math.tanh %200 : vector<2x32xf32>
    %cst_56 = arith.constant 1.000000e+00 : f32
    %202 = vector.broadcast %cst_56 : f32 to vector<2x32xf32>
    %203 = arith.subf %202, %194 : vector<2x32xf32>
    %204 = arith.mulf %203, %201 : vector<2x32xf32>
    %205 = arith.mulf %194, %172 : vector<2x32xf32>
    %206 = arith.addf %204, %205 : vector<2x32xf32>
    %c5_57 = arith.constant 5 : index
    %c0_58 = arith.constant 0 : index
    %c0_59 = arith.constant 0 : index
    %207 = vector.load %arg4[%c5_57, %c0_58, %c0_59] : memref<8x2x32xf32, #tpu.memory_space<vmem>>, vector<1x2x32xf32>
    %208 = vector.shape_cast %207 : vector<1x2x32xf32> to vector<2x32xf32>
    %209 = vector.shape_cast %206 : vector<2x32xf32> to vector<1x2x32xf32>
    tpu.vector_store %arg4[%c5_57, %c0_58, %c0_59], %209 {strides = array<i32>} : memref<8x2x32xf32, #tpu.memory_space<vmem>>, vector<1x2x32xf32>,
    %c6 = arith.constant 6 : index
    %c0_60 = arith.constant 0 : index
    %c0_61 = arith.constant 0 : index
    %210 = vector.load %arg1[%c6, %c0_60, %c0_61] : memref<8x2x96xf32, #tpu.memory_space<vmem>>, vector<1x2x96xf32>
    %211 = vector.shape_cast %210 : vector<1x2x96xf32> to vector<2x96xf32>
    %cst_62 = arith.constant dense<0.000000e+00> : vector<2x96xf32>
    %212 = tpu.matmul %206, %3, %cst_62 {dimension_numbers = #tpu.dot_dimension_numbers<[1], [0], [0], [1], [0, 0, 1, 1], [], []>} : vector<2x32xf32>, vector<32x96xf32>, vector<2x96xf32> -> vector<2x96xf32>
    %213 = vector.extract_strided_slice %211 {offsets = [0, 0], sizes = [2, 32], strides = [1, 1]} : vector<2x96xf32> to vector<2x32xf32>
    %214 = vector.extract_strided_slice %212 {offsets = [0, 0], sizes = [2, 32], strides = [1, 1]} : vector<2x96xf32> to vector<2x32xf32>
    %215 = arith.addf %213, %214 : vector<2x32xf32>
    %216 = arith.negf %215 : vector<2x32xf32>
    %217 = math.exp %216 : vector<2x32xf32>
    %cst_63 = arith.constant 1.000000e+00 : f32
    %218 = vector.broadcast %cst_63 : f32 to vector<2x32xf32>
    %219 = arith.addf %218, %217 : vector<2x32xf32>
    %220 = arith.divf %218, %219 : vector<2x32xf32>
    %221 = vector.extract_strided_slice %211 {offsets = [0, 32], sizes = [2, 32], strides = [1, 1]} : vector<2x96xf32> to vector<2x32xf32>
    %222 = vector.extract_strided_slice %212 {offsets = [0, 32], sizes = [2, 32], strides = [1, 1]} : vector<2x96xf32> to vector<2x32xf32>
    %223 = arith.addf %221, %222 : vector<2x32xf32>
    %224 = arith.negf %223 : vector<2x32xf32>
    %225 = math.exp %224 : vector<2x32xf32>
    %cst_64 = arith.constant 1.000000e+00 : f32
    %226 = vector.broadcast %cst_64 : f32 to vector<2x32xf32>
    %227 = arith.addf %226, %225 : vector<2x32xf32>
    %228 = arith.divf %226, %227 : vector<2x32xf32>
    %229 = vector.extract_strided_slice %211 {offsets = [0, 64], sizes = [2, 32], strides = [1, 1]} : vector<2x96xf32> to vector<2x32xf32>
    %230 = vector.extract_strided_slice %212 {offsets = [0, 64], sizes = [2, 32], strides = [1, 1]} : vector<2x96xf32> to vector<2x32xf32>
    %231 = vector.broadcast %4 : vector<1x32xf32> to vector<2x32xf32>
    %232 = arith.addf %230, %231 : vector<2x32xf32>
    %233 = arith.mulf %220, %232 : vector<2x32xf32>
    %234 = arith.addf %229, %233 : vector<2x32xf32>
    %235 = math.tanh %234 : vector<2x32xf32>
    %cst_65 = arith.constant 1.000000e+00 : f32
    %236 = vector.broadcast %cst_65 : f32 to vector<2x32xf32>
    %237 = arith.subf %236, %228 : vector<2x32xf32>
    %238 = arith.mulf %237, %235 : vector<2x32xf32>
    %239 = arith.mulf %228, %206 : vector<2x32xf32>
    %240 = arith.addf %238, %239 : vector<2x32xf32>
    %c6_66 = arith.constant 6 : index
    %c0_67 = arith.constant 0 : index
    %c0_68 = arith.constant 0 : index
    %241 = vector.load %arg4[%c6_66, %c0_67, %c0_68] : memref<8x2x32xf32, #tpu.memory_space<vmem>>, vector<1x2x32xf32>
    %242 = vector.shape_cast %241 : vector<1x2x32xf32> to vector<2x32xf32>
    %243 = vector.shape_cast %240 : vector<2x32xf32> to vector<1x2x32xf32>
    tpu.vector_store %arg4[%c6_66, %c0_67, %c0_68], %243 {strides = array<i32>} : memref<8x2x32xf32, #tpu.memory_space<vmem>>, vector<1x2x32xf32>,
    %c7 = arith.constant 7 : index
    %c0_69 = arith.constant 0 : index
    %c0_70 = arith.constant 0 : index
    %244 = vector.load %arg1[%c7, %c0_69, %c0_70] : memref<8x2x96xf32, #tpu.memory_space<vmem>>, vector<1x2x96xf32>
    %245 = vector.shape_cast %244 : vector<1x2x96xf32> to vector<2x96xf32>
    %cst_71 = arith.constant dense<0.000000e+00> : vector<2x96xf32>
    %246 = tpu.matmul %240, %3, %cst_71 {dimension_numbers = #tpu.dot_dimension_numbers<[1], [0], [0], [1], [0, 0, 1, 1], [], []>} : vector<2x32xf32>, vector<32x96xf32>, vector<2x96xf32> -> vector<2x96xf32>
    %247 = vector.extract_strided_slice %245 {offsets = [0, 0], sizes = [2, 32], strides = [1, 1]} : vector<2x96xf32> to vector<2x32xf32>
    %248 = vector.extract_strided_slice %246 {offsets = [0, 0], sizes = [2, 32], strides = [1, 1]} : vector<2x96xf32> to vector<2x32xf32>
    %249 = arith.addf %247, %248 : vector<2x32xf32>
    %250 = arith.negf %249 : vector<2x32xf32>
    %251 = math.exp %250 : vector<2x32xf32>
    %cst_72 = arith.constant 1.000000e+00 : f32
    %252 = vector.broadcast %cst_72 : f32 to vector<2x32xf32>
    %253 = arith.addf %252, %251 : vector<2x32xf32>
    %254 = arith.divf %252, %253 : vector<2x32xf32>
    %255 = vector.extract_strided_slice %245 {offsets = [0, 32], sizes = [2, 32], strides = [1, 1]} : vector<2x96xf32> to vector<2x32xf32>
    %256 = vector.extract_strided_slice %246 {offsets = [0, 32], sizes = [2, 32], strides = [1, 1]} : vector<2x96xf32> to vector<2x32xf32>
    %257 = arith.addf %255, %256 : vector<2x32xf32>
    %258 = arith.negf %257 : vector<2x32xf32>
    %259 = math.exp %258 : vector<2x32xf32>
    %cst_73 = arith.constant 1.000000e+00 : f32
    %260 = vector.broadcast %cst_73 : f32 to vector<2x32xf32>
    %261 = arith.addf %260, %259 : vector<2x32xf32>
    %262 = arith.divf %260, %261 : vector<2x32xf32>
    %263 = vector.extract_strided_slice %245 {offsets = [0, 64], sizes = [2, 32], strides = [1, 1]} : vector<2x96xf32> to vector<2x32xf32>
    %264 = vector.extract_strided_slice %246 {offsets = [0, 64], sizes = [2, 32], strides = [1, 1]} : vector<2x96xf32> to vector<2x32xf32>
    %265 = vector.broadcast %4 : vector<1x32xf32> to vector<2x32xf32>
    %266 = arith.addf %264, %265 : vector<2x32xf32>
    %267 = arith.mulf %254, %266 : vector<2x32xf32>
    %268 = arith.addf %263, %267 : vector<2x32xf32>
    %269 = math.tanh %268 : vector<2x32xf32>
    %cst_74 = arith.constant 1.000000e+00 : f32
    %270 = vector.broadcast %cst_74 : f32 to vector<2x32xf32>
    %271 = arith.subf %270, %262 : vector<2x32xf32>
    %272 = arith.mulf %271, %269 : vector<2x32xf32>
    %273 = arith.mulf %262, %240 : vector<2x32xf32>
    %274 = arith.addf %272, %273 : vector<2x32xf32>
    %c7_75 = arith.constant 7 : index
    %c0_76 = arith.constant 0 : index
    %c0_77 = arith.constant 0 : index
    %275 = vector.load %arg4[%c7_75, %c0_76, %c0_77] : memref<8x2x32xf32, #tpu.memory_space<vmem>>, vector<1x2x32xf32>
    %276 = vector.shape_cast %275 : vector<1x2x32xf32> to vector<2x32xf32>
    %277 = vector.shape_cast %274 : vector<2x32xf32> to vector<1x2x32xf32>
    tpu.vector_store %arg4[%c7_75, %c0_76, %c0_77], %277 {strides = array<i32>} : memref<8x2x32xf32, #tpu.memory_space<vmem>>, vector<1x2x32xf32>,
    %c0_78 = arith.constant 0 : index
    %c0_79 = arith.constant 0 : index
    %278 = vector.load %arg5[%c0_78, %c0_79] : memref<2x32xf32, #tpu.memory_space<vmem>>, vector<2x32xf32>
    tpu.vector_store %arg5[%c0_78, %c0_79], %274 {strides = array<i32>} : memref<2x32xf32, #tpu.memory_space<vmem>>, vector<2x32xf32>,
    return
  }
  func.func @transform_0(%arg0: i32) -> (i32, i32, i32) {
    %c0_i32 = arith.constant 0 : i32
    %c0_i32_0 = arith.constant 0 : i32
    %c0_i32_1 = arith.constant 0 : i32
    return %arg0, %c0_i32, %c0_i32_0 : i32, i32, i32
  }
  func.func @transform_1(%arg0: i32) -> (i32, i32) {
    %c0_i32 = arith.constant 0 : i32
    %c0_i32_0 = arith.constant 0 : i32
    %c0_i32_1 = arith.constant 0 : i32
    return %c0_i32, %c0_i32_0 : i32, i32
  }
  func.func @transform_2(%arg0: i32) -> (i32, i32) {
    %c0_i32 = arith.constant 0 : i32
    %c0_i32_0 = arith.constant 0 : i32
    %c0_i32_1 = arith.constant 0 : i32
    return %c0_i32, %c0_i32_0 : i32, i32
  }
  func.func @transform_3(%arg0: i32) -> (i32, i32, i32) {
    %c0_i32 = arith.constant 0 : i32
    %c0_i32_0 = arith.constant 0 : i32
    %c0_i32_1 = arith.constant 0 : i32
    return %arg0, %c0_i32, %c0_i32_0 : i32, i32, i32
  }
  func.func @transform_4(%arg0: i32) -> (i32, i32) {
    %c0_i32 = arith.constant 0 : i32
    %c0_i32_0 = arith.constant 0 : i32
    %c0_i32_1 = arith.constant 0 : i32
    return %c0_i32, %c0_i32_0 : i32, i32
  }
}

</mosaic_0001>

<bundles_post_ra>
// kernel: tpu_custom_call.1
= control target key start
LH: loop header
LB: loop body
LE: loop exit
PB: predicated region body
PF: predicated region fallthrough
CT: control target
= control target key end

     0   :  { %10 = vsyncpa [#allocation3], 0  ;;  %s967_s0 = inlined_call_operand.hbm [shape: f32[8,2,96], index: 0, kind: input, shape index: {}]   ;;  %s968_s1 = inlined_call_operand.hbm [shape: f32[32,96], index: 1, kind: input, shape index: {}]   ;;  %s969_s2 = inlined_call_operand.vmem [shape: f32[1,32], index: 2, kind: input, shape index: {}]   ;;  %s970_s3 = inlined_call_operand.hbm [shape: f32[8,2,32], index: 3, kind: output, shape index: {0}]   ;;  %s971_s4 = inlined_call_operand.hbm [shape: f32[2,32], index: 4, kind: output, shape index: {1}]  }
   0x1   :  { %11 = vsyncpa [#allocation6], 0 }
   0x2   :  { %12 = vsyncpa [#allocation4], 0 }
   0x3   :  { %13 = vsyncpa [#allocation9], 0  ;;  %s18_s17 = sshll.u32 %s967_s0, 4  ;;  %s848_s18 = smov [#allocation2]   ;;  %s19_s17 = int_to_ptr.hbm [resolvable:$true] %s18_s17 }
   0x4   :  { %s20_s19 = sshll.u32 %s848_s18, 4  ;;  %s31_s22 = sshll.u32 %s968_s1, 4  ;;  %s21_s19 = int_to_ptr.vmem [resolvable:$true] %s20_s19  ;;  %s32_s22 = int_to_ptr.hbm [resolvable:$true] %s31_s22 }
   0x5   :  { %s849_s23 = smov 32   ;;  %s850_s24 = smov 2  }
   0x6   :  { %26 = dma.hbm_to_vmem [thread:$0]  %s19_s17, 256, %s21_s19, [#allocation3], %s849_s23, %s849_s23, %s850_s24  }
   0x7   :  { %s851_s25 = smov [#allocation5]   ;;  %s852_s27 = smov 128  }
   0x8   :  { %s33_s26 = sshll.u32 %s851_s25, 4  ;;  %s853_s0 = smov 8   ;;  %s34_s26 = int_to_ptr.vmem [resolvable:$true] %s33_s26 }
   0x9   :  { %39 = dma.hbm_to_vmem [thread:$0]  %s32_s22, 512, %s34_s26, [#allocation6], %s852_s27, %s852_s27, %s853_s0  }
   0xa   :  { %840 = dma.done.wait [#allocation3], 256  }
   0xb   :  { %841 = vsyncadd [#allocation3], 4294967040 }
   0xc   :  { %842 = dma.done.wait [#allocation6], 512  }
   0xd   :  { %843 = vsyncadd [#allocation6], 4294966784  ;;  %vm54_vm0 = vcmask 254976   ;;  %v854_v0 = vmov 0.0   ;;  %v59_v1 = vld [vmem:[#allocation5 + $0x18] sm:$0xff]  ;;  %v58_v2 = vld [vmem:[#allocation5 + $0x10] sm:$0xff] }
   0xe   :  { %55 = vst.msk [vmem:[#allocation8] sm:$0x3] %vm54_vm0, %v854_v0  ;;  %79 = vmatpush.msra.mxu0 %v59_v1  ;;  %157 = vmatpush.msra.mxu1 %v59_v1  ;;  %v57_v4 = vld [vmem:[#allocation5 + $0x8] sm:$0xff]  ;;  %v695_v5 = vld [vmem:[%s969_s2] ss:$0 sm:$0xff]  ;;  %v56_v6 = vld [vmem:[#allocation5] sm:$0xff] }
   0xf   :  { %227 = vmatpush.msra.mxu2 %v59_v1  ;;  %s855_s29 = smov 64   ;;  %vm63_vm1 = vcmask 261120   ;;  %297 = vmatpush.msra.mxu3 %v59_v1  ;;  %v62_v10 = vld [vmem:[#allocation2] sm:$0x3]  ;;  %s856_s2 = smov 96  }
  0x10   :  { %80 = vmatpush.msra.mxu0 %v58_v2  ;;  %158 = vmatpush.msra.mxu1 %v58_v2  ;;  %v142_v39 = vld [vmem:[#allocation2 + $0x2] sm:$0x3]  ;;  %s857_s30 = smov [#allocation7]   ;;  %s638_s8 = sshll.u32 %s970_s3, 4  ;;  %s639_s8 = int_to_ptr.hbm [resolvable:$true] %s638_s8 }
  0x11   :  { %109 = vrot.lane.b32.xlu0 %v695_v5, %s855_s29  ;;  %228 = vmatpush.msra.mxu2 %v58_v2  ;;  %s636_s5 = sshll.u32 %s857_s30, 4  ;;  %s858_s9 = smov [#allocation8]   ;;  %s637_s5 = int_to_ptr.vmem [resolvable:$true] %s636_s5 }
  0x12   :  { %81 = vmatpush.msra.mxu0 %v57_v4  ;;  %159 = vmatpush.msra.mxu1 %v57_v4  ;;  %s650_s10 = sshll.u32 %s858_s9, 4  ;;  %s652_s13 = sshll.u32 %s971_s4, 4  ;;  %s651_s10 = int_to_ptr.vmem [resolvable:$true] %s650_s10  ;;  %s653_s13 = int_to_ptr.hbm [resolvable:$true] %s652_s13 }
  0x13   :  { %229 = vmatpush.msra.mxu2 %v57_v4  ;;  %298 = vmatpush.msra.mxu3 %v58_v2 }
  0x14   :  { %82 = vmatpush.msra.mxu0 %v56_v6  ;;  %160 = vmatpush.msra.mxu1 %v56_v6 }
  0x15   :  { %v61_v3 = vld [vmem:[#allocation8] sm:$0x3]  ;;  %230 = vmatpush.msra.mxu2 %v56_v6  ;;  %299 = vmatpush.msra.mxu3 %v57_v4 }
  0x16   :  { %130 = vrot.lane.b32.xlu2 %v61_v3, %s849_s23  ;;  %668 = vmatmul.msk.f32.vlgmr.msra.gmra.mxu0 %vm63_vm1, %v61_v3  ;;  %v212_v3 = vld [vmem:[#allocation2 + $0x4] sm:$0x3] }
  0x17   :  { %367 = vmatpush.msrb.mxu0 %v59_v1  ;;  %437 = vmatpush.msrb.mxu1 %v59_v1 }
  0x18   :  { %507 = vmatpush.msrb.mxu2 %v59_v1  ;;  %300 = vmatpush.msra.mxu3 %v56_v6 }
  0x19   :  { %368 = vmatpush.msrb.mxu0 %v58_v2  ;;  %438 = vmatpush.msrb.mxu1 %v58_v2 }
  0x1a   :  { %508 = vmatpush.msrb.mxu2 %v58_v2  ;;  %577 = vmatpush.msrb.mxu3 %v59_v1 }
  0x1b   :  { %369 = vmatpush.msrb.mxu0 %v57_v4  ;;  %439 = vmatpush.msrb.mxu1 %v57_v4 }
  0x1c   :  { %509 = vmatpush.msrb.mxu2 %v57_v4  ;;  %578 = vmatpush.msrb.mxu3 %v58_v2 }
  0x1d   :  { %370 = vmatpush.msrb.mxu0 %v56_v6  ;;  %440 = vmatpush.msrb.mxu1 %v56_v6 }
  0x1e   :  { %510 = vmatpush.msrb.mxu2 %v56_v6  ;;  %579 = vmatpush.msrb.mxu3 %v57_v4 }
  0x20   :  { %580 = vmatpush.msrb.mxu3 %v56_v6 }
  0x70   :  { %v131_v30 = vpop.permute.xlu2 %130 }
  0x83   :  { %v900_v7 = vpop.permute.xlu0 %109 }
  0x93   :  { %v84_v8 = vpop.f32.mrf.mxu0 }
  0x94   :  { %v112_v9 = vadd.f32 %v900_v7, %v84_v8  ;;  %v87_v11 = vadd.f32 %v84_v8, %v62_v10 }
  0x96   :  { %114 = vrot.lane.b32.xlu0 %v112_v9, %s855_s29  ;;  %v669_v12 = vmul.f32 -1.442695, %v87_v11 }
  0x98   :  { %696 = vpow2.f32 %v669_v12 }
  0x9e   :  { %v697_v13 = vpop.eup %696 }
  0x9f   :  { %v91_v14 = vadd.f32 1.0, %v697_v13 }
  0xa1   :  { %698 = vrcp.f32 %v91_v14  ;;  %v103_v20 = vand.u32 2147483648, %v91_v14  ;;  %vm97_vm3 = vweird.f32 %v91_v14  ;;  %v101_v21 = vand.u32 2147483647, %v91_v14 }
  0xa3   :  { %v104_v23 = vor.u32 1.1754944e-38, %v103_v20  ;;  %vm102_vm5 = vcmp.eq.f32.partialorder %v101_v21, 8.507059e+37 }
  0xa7   :  { %v699_v15 = vpop.eup %698 }
  0xa8   :  { %v93_v16 = vmul.f32 %v699_v15, %v91_v14  ;;  %vm98_vm2 = vweird.f32 %v699_v15 }
  0xa9   :  { %vm99_vm4 = vmor %vm97_vm3, %vm98_vm2 }
  0xaa   :  { %v94_v17 = vsub.f32 1.0, %v93_v16 }
  0xac   :  { %v95_v18 = vmul.f32 %v699_v15, %v94_v17 }
  0xae   :  { %v96_v19 = vadd.f32 %v699_v15, %v95_v18 }
  0xb0   :  { %v100_v22 = vsel %vm99_vm4, %v699_v15, %v96_v19 }
  0xb1   :  { %v105_v24 = vsel %vm102_vm5, %v104_v23, %v100_v22 }
  0xb2   :  { %v124_v31 = vsub.f32 1.0, %v105_v24  ;;  %v133_v33 = vmul.f32 %v131_v30, %v105_v24 }
 0x108   :  { %v115_v25 = vpop.permute.xlu0 %114 }
 0x109   :  { %v117_v26 = vmul.f32 %v115_v25, %v105_v24 }
 0x10b   :  { %119 = vrot.lane.b32.xlu1 %v117_v26, %s855_s29 }
 0x17d   :  { %v120_v27 = vpop.permute.xlu1 %119 }
 0x17e   :  { %v122_v28 = vadd.f32 %v120_v27, %v62_v10 }
 0x180   :  { %700 = vtanh.f32 %v122_v28 }
 0x186   :  { %v701_v29 = vpop.eup %700 }
 0x187   :  { %126 = vrot.lane.b32.xlu1 %v701_v29, %s856_s2 }
 0x1f9   :  { %v127_v32 = vpop.permute.xlu1 %126 }
 0x1fa   :  { %v129_v34 = vmul.f32 %v127_v32, %v124_v31  ;;  %v282_v32 = vld [vmem:[#allocation2 + $0x6] sm:$0x3] }
 0x1fc   :  { %v134_v35 = vadd.f32 %v133_v33, %v129_v34 }
 0x1fe   :  { %136 = vrot.lane.b32.xlu2 %v134_v35, %s856_s2 }
 0x258   :  { %v137_v36 = vpop.permute.xlu2 %136 }
 0x259   :  { %140 = vst.msk [vmem:[#allocation7] sm:$0x3] %vm54_vm0, %v137_v36  ;;  %670 = vmatmul.msk.f32.vlgmr.msra.gmra.mxu1 %vm63_vm1, %v137_v36 }
 0x2d6   :  { %v162_v37 = vpop.f32.mrf.mxu1 }
 0x2d7   :  { %v185_v38 = vadd.f32 %v162_v37, %v900_v7  ;;  %v165_v40 = vadd.f32 %v162_v37, %v142_v39 }
 0x2d9   :  { %187 = vrot.lane.b32.xlu0 %v185_v38, %s855_s29  ;;  %v671_v41 = vmul.f32 -1.442695, %v165_v40 }
 0x2db   :  { %702 = vpow2.f32 %v671_v41 }
 0x2e1   :  { %v703_v42 = vpop.eup %702 }
 0x2e2   :  { %v169_v43 = vadd.f32 1.0, %v703_v42 }
 0x2e4   :  { %704 = vrcp.f32 %v169_v43  ;;  %v181_v49 = vand.u32 2147483648, %v169_v43  ;;  %vm175_vm7 = vweird.f32 %v169_v43  ;;  %v179_v50 = vand.u32 2147483647, %v169_v43 }
 0x2e6   :  { %v182_v52 = vor.u32 1.1754944e-38, %v181_v49  ;;  %vm180_vm9 = vcmp.eq.f32.partialorder %v179_v50, 8.507059e+37 }
 0x2ea   :  { %v705_v44 = vpop.eup %704 }
 0x2eb   :  { %v171_v45 = vmul.f32 %v705_v44, %v169_v43  ;;  %vm176_vm6 = vweird.f32 %v705_v44 }
 0x2ec   :  { %vm177_vm8 = vmor %vm175_vm7, %vm176_vm6 }
 0x2ed   :  { %v172_v46 = vsub.f32 1.0, %v171_v45 }
 0x2ef   :  { %v173_v47 = vmul.f32 %v705_v44, %v172_v46 }
 0x2f1   :  { %v174_v48 = vadd.f32 %v705_v44, %v173_v47 }
 0x2f3   :  { %v178_v51 = vsel %vm177_vm8, %v705_v44, %v174_v48 }
 0x2f4   :  { %v183_v54 = vsel %vm180_vm9, %v182_v52, %v178_v51 }
 0x2f5   :  { %v197_v59 = vsub.f32 1.0, %v183_v54  ;;  %v203_v61 = vmul.f32 %v183_v54, %v134_v35 }
 0x34b   :  { %v188_v53 = vpop.permute.xlu0 %187 }
 0x34c   :  { %v190_v55 = vmul.f32 %v188_v53, %v183_v54 }
 0x34e   :  { %192 = vrot.lane.b32.xlu1 %v190_v55, %s855_s29 }
 0x3c0   :  { %v193_v56 = vpop.permute.xlu1 %192 }
 0x3c1   :  { %v195_v57 = vadd.f32 %v193_v56, %v142_v39 }
 0x3c3   :  { %706 = vtanh.f32 %v195_v57 }
 0x3c9   :  { %v707_v58 = vpop.eup %706 }
 0x3ca   :  { %199 = vrot.lane.b32.xlu2 %v707_v58, %s856_s2 }
 0x424   :  { %v200_v60 = vpop.permute.xlu2 %199 }
 0x425   :  { %v202_v62 = vmul.f32 %v200_v60, %v197_v59  ;;  %v352_v60 = vld [vmem:[#allocation2 + $0x8] sm:$0x3] }
 0x427   :  { %v204_v63 = vadd.f32 %v203_v61, %v202_v62 }
 0x429   :  { %206 = vrot.lane.b32.xlu0 %v204_v63, %s856_s2 }
 0x49b   :  { %v207_v0 = vpop.permute.xlu0 %206 }
 0x49c   :  { %210 = vst.msk [vmem:[#allocation7 + $0x2] sm:$0x3] %vm54_vm0, %v207_v0  ;;  %672 = vmatmul.msk.f32.vlgmr.msra.gmra.mxu2 %vm63_vm1, %v207_v0 }
 0x51f   :  { %v232_v1 = vpop.f32.mrf.mxu2 }
 0x520   :  { %v255_v2 = vadd.f32 %v232_v1, %v900_v7  ;;  %v235_v4 = vadd.f32 %v232_v1, %v212_v3 }
 0x522   :  { %257 = vrot.lane.b32.xlu1 %v255_v2, %s855_s29  ;;  %v673_v5 = vmul.f32 -1.442695, %v235_v4 }
 0x524   :  { %708 = vpow2.f32 %v673_v5 }
 0x52a   :  { %v709_v6 = vpop.eup %708 }
 0x52b   :  { %v239_v8 = vadd.f32 1.0, %v709_v6 }
 0x52d   :  { %710 = vrcp.f32 %v239_v8  ;;  %v251_v14 = vand.u32 2147483648, %v239_v8  ;;  %vm245_vm11 = vweird.f32 %v239_v8  ;;  %v249_v15 = vand.u32 2147483647, %v239_v8 }
 0x52f   :  { %v252_v17 = vor.u32 1.1754944e-38, %v251_v14  ;;  %vm250_vm13 = vcmp.eq.f32.partialorder %v249_v15, 8.507059e+37 }
 0x533   :  { %v711_v9 = vpop.eup %710 }
 0x534   :  { %v241_v10 = vmul.f32 %v711_v9, %v239_v8  ;;  %vm246_vm10 = vweird.f32 %v711_v9 }
 0x535   :  { %vm247_vm12 = vmor %vm245_vm11, %vm246_vm10 }
 0x536   :  { %v242_v11 = vsub.f32 1.0, %v241_v10 }
 0x538   :  { %v243_v12 = vmul.f32 %v711_v9, %v242_v11 }
 0x53a   :  { %v244_v13 = vadd.f32 %v711_v9, %v243_v12 }
 0x53c   :  { %v248_v16 = vsel %vm247_vm12, %v711_v9, %v244_v13 }
 0x53d   :  { %v253_v19 = vsel %vm250_vm13, %v252_v17, %v248_v16 }
 0x53e   :  { %v267_v24 = vsub.f32 1.0, %v253_v19  ;;  %v273_v26 = vmul.f32 %v253_v19, %v204_v63 }
 0x594   :  { %v258_v18 = vpop.permute.xlu1 %257 }
 0x595   :  { %v260_v20 = vmul.f32 %v258_v18, %v253_v19 }
 0x597   :  { %262 = vrot.lane.b32.xlu2 %v260_v20, %s855_s29 }
 0x5f1   :  { %v263_v21 = vpop.permute.xlu2 %262 }
 0x5f2   :  { %v265_v22 = vadd.f32 %v263_v21, %v212_v3 }
 0x5f4   :  { %712 = vtanh.f32 %v265_v22 }
 0x5fa   :  { %v713_v23 = vpop.eup %712 }
 0x5fb   :  { %269 = vrot.lane.b32.xlu0 %v713_v23, %s856_s2 }
 0x66d   :  { %v270_v25 = vpop.permute.xlu0 %269 }
 0x66e   :  { %v272_v27 = vmul.f32 %v270_v25, %v267_v24  ;;  %v422_v25 = vld [vmem:[#allocation2 + $0xa] sm:$0x3] }
 0x670   :  { %v274_v28 = vadd.f32 %v273_v26, %v272_v27 }
 0x672   :  { %276 = vrot.lane.b32.xlu1 %v274_v28, %s856_s2 }
 0x6e4   :  { %v277_v29 = vpop.permute.xlu1 %276 }
 0x6e5   :  { %280 = vst.msk [vmem:[#allocation7 + $0x4] sm:$0x3] %vm54_vm0, %v277_v29  ;;  %674 = vmatmul.msk.f32.vlgmr.msra.gmra.mxu3 %vm63_vm1, %v277_v29 }
 0x768   :  { %v302_v30 = vpop.f32.mrf.mxu3 }
 0x769   :  { %v325_v31 = vadd.f32 %v302_v30, %v900_v7  ;;  %v305_v33 = vadd.f32 %v302_v30, %v282_v32 }
 0x76b   :  { %327 = vrot.lane.b32.xlu2 %v325_v31, %s855_s29  ;;  %v675_v34 = vmul.f32 -1.442695, %v305_v33 }
 0x76d   :  { %714 = vpow2.f32 %v675_v34 }
 0x773   :  { %v715_v35 = vpop.eup %714 }
 0x774   :  { %v309_v36 = vadd.f32 1.0, %v715_v35 }
 0x776   :  { %716 = vrcp.f32 %v309_v36  ;;  %v321_v42 = vand.u32 2147483648, %v309_v36  ;;  %vm315_vm15 = vweird.f32 %v309_v36  ;;  %v319_v43 = vand.u32 2147483647, %v309_v36 }
 0x778   :  { %v322_v45 = vor.u32 1.1754944e-38, %v321_v42  ;;  %vm320_vm3 = vcmp.eq.f32.partialorder %v319_v43, 8.507059e+37 }
 0x77c   :  { %v717_v37 = vpop.eup %716 }
 0x77d   :  { %v311_v38 = vmul.f32 %v717_v37, %v309_v36  ;;  %vm316_vm14 = vweird.f32 %v717_v37 }
 0x77e   :  { %vm317_vm2 = vmor %vm315_vm15, %vm316_vm14 }
 0x77f   :  { %v312_v39 = vsub.f32 1.0, %v311_v38 }
 0x781   :  { %v313_v40 = vmul.f32 %v717_v37, %v312_v39 }
 0x783   :  { %v314_v41 = vadd.f32 %v717_v37, %v313_v40 }
 0x785   :  { %v318_v44 = vsel %vm317_vm2, %v717_v37, %v314_v41 }
 0x786   :  { %v323_v47 = vsel %vm320_vm3, %v322_v45, %v318_v44 }
 0x787   :  { %v337_v52 = vsub.f32 1.0, %v323_v47  ;;  %v343_v54 = vmul.f32 %v323_v47, %v274_v28 }
 0x7c5   :  { %v328_v46 = vpop.permute.xlu2 %327 }
 0x7c6   :  { %v330_v48 = vmul.f32 %v328_v46, %v323_v47 }
 0x7c8   :  { %332 = vrot.lane.b32.xlu0 %v330_v48, %s855_s29 }
 0x83a   :  { %v333_v49 = vpop.permute.xlu0 %332 }
 0x83b   :  { %v335_v50 = vadd.f32 %v333_v49, %v282_v32 }
 0x83d   :  { %718 = vtanh.f32 %v335_v50 }
 0x843   :  { %v719_v51 = vpop.eup %718 }
 0x844   :  { %339 = vrot.lane.b32.xlu1 %v719_v51, %s856_s2 }
 0x8b6   :  { %v340_v53 = vpop.permute.xlu1 %339 }
 0x8b7   :  { %v342_v55 = vmul.f32 %v340_v53, %v337_v52  ;;  %v492_v53 = vld [vmem:[#allocation2 + $0xc] sm:$0x3] }
 0x8b9   :  { %v344_v56 = vadd.f32 %v343_v54, %v342_v55 }
 0x8bb   :  { %346 = vrot.lane.b32.xlu2 %v344_v56, %s856_s2 }
 0x915   :  { %v347_v57 = vpop.permute.xlu2 %346 }
 0x916   :  { %350 = vst.msk [vmem:[#allocation7 + $0x6] sm:$0x3] %vm54_vm0, %v347_v57  ;;  %676 = vmatmul.msk.f32.vlgmr.msrb.gmra.mxu0 %vm63_vm1, %v347_v57 }
 0x993   :  { %v372_v58 = vpop.f32.mrf.mxu0 }
 0x994   :  { %v395_v59 = vadd.f32 %v372_v58, %v900_v7  ;;  %v375_v61 = vadd.f32 %v372_v58, %v352_v60 }
 0x996   :  { %397 = vrot.lane.b32.xlu0 %v395_v59, %s855_s29  ;;  %v677_v62 = vmul.f32 -1.442695, %v375_v61 }
 0x998   :  { %720 = vpow2.f32 %v677_v62 }
 0x99e   :  { %v721_v63 = vpop.eup %720 }
 0x99f   :  { %v379_v0 = vadd.f32 1.0, %v721_v63 }
 0x9a1   :  { %722 = vrcp.f32 %v379_v0  ;;  %v391_v6 = vand.u32 2147483648, %v379_v0  ;;  %vm385_vm5 = vweird.f32 %v379_v0  ;;  %v389_v8 = vand.u32 2147483647, %v379_v0 }
 0x9a3   :  { %v392_v10 = vor.u32 1.1754944e-38, %v391_v6  ;;  %vm390_vm7 = vcmp.eq.f32.partialorder %v389_v8, 8.507059e+37 }
 0x9a7   :  { %v723_v1 = vpop.eup %722 }
 0x9a8   :  { %v381_v2 = vmul.f32 %v723_v1, %v379_v0  ;;  %vm386_vm4 = vweird.f32 %v723_v1 }
 0x9a9   :  { %vm387_vm6 = vmor %vm385_vm5, %vm386_vm4 }
 0x9aa   :  { %v382_v3 = vsub.f32 1.0, %v381_v2 }
 0x9ac   :  { %v383_v4 = vmul.f32 %v723_v1, %v382_v3 }
 0x9ae   :  { %v384_v5 = vadd.f32 %v723_v1, %v383_v4 }
 0x9b0   :  { %v388_v9 = vsel %vm387_vm6, %v723_v1, %v384_v5 }
 0x9b1   :  { %v393_v12 = vsel %vm390_vm7, %v392_v10, %v388_v9 }
 0x9b2   :  { %v407_v17 = vsub.f32 1.0, %v393_v12  ;;  %v413_v19 = vmul.f32 %v393_v12, %v344_v56 }
 0xa08   :  { %v398_v11 = vpop.permute.xlu0 %397 }
 0xa09   :  { %v400_v13 = vmul.f32 %v398_v11, %v393_v12 }
 0xa0b   :  { %402 = vrot.lane.b32.xlu1 %v400_v13, %s855_s29 }
 0xa7d   :  { %v403_v14 = vpop.permute.xlu1 %402 }
 0xa7e   :  { %v405_v15 = vadd.f32 %v403_v14, %v352_v60 }
 0xa80   :  { %724 = vtanh.f32 %v405_v15 }
 0xa86   :  { %v725_v16 = vpop.eup %724 }
 0xa87   :  { %409 = vrot.lane.b32.xlu2 %v725_v16, %s856_s2 }
 0xae1   :  { %v410_v18 = vpop.permute.xlu2 %409 }
 0xae2   :  { %v412_v20 = vmul.f32 %v410_v18, %v407_v17  ;;  %v562_v18 = vld [vmem:[#allocation2 + $0xe] sm:$0x3] }
 0xae4   :  { %v414_v21 = vadd.f32 %v413_v19, %v412_v20 }
 0xae6   :  { %416 = vrot.lane.b32.xlu0 %v414_v21, %s856_s2 }
 0xb58   :  { %v417_v22 = vpop.permute.xlu0 %416 }
 0xb59   :  { %420 = vst.msk [vmem:[#allocation7 + $0x8] sm:$0x3] %vm54_vm0, %v417_v22  ;;  %678 = vmatmul.msk.f32.vlgmr.msrb.gmra.mxu1 %vm63_vm1, %v417_v22 }
 0xbd6   :  { %v442_v23 = vpop.f32.mrf.mxu1 }
 0xbd7   :  { %v465_v24 = vadd.f32 %v442_v23, %v900_v7  ;;  %v445_v26 = vadd.f32 %v442_v23, %v422_v25 }
 0xbd9   :  { %467 = vrot.lane.b32.xlu1 %v465_v24, %s855_s29  ;;  %v679_v27 = vmul.f32 -1.442695, %v445_v26 }
 0xbdb   :  { %726 = vpow2.f32 %v679_v27 }
 0xbe1   :  { %v727_v28 = vpop.eup %726 }
 0xbe2   :  { %v449_v29 = vadd.f32 1.0, %v727_v28 }
 0xbe4   :  { %728 = vrcp.f32 %v449_v29  ;;  %v461_v35 = vand.u32 2147483648, %v449_v29  ;;  %vm455_vm9 = vweird.f32 %v449_v29  ;;  %v459_v36 = vand.u32 2147483647, %v449_v29 }
 0xbe6   :  { %v462_v38 = vor.u32 1.1754944e-38, %v461_v35  ;;  %vm460_vm11 = vcmp.eq.f32.partialorder %v459_v36, 8.507059e+37 }
 0xbea   :  { %v729_v30 = vpop.eup %728 }
 0xbeb   :  { %v451_v31 = vmul.f32 %v729_v30, %v449_v29  ;;  %vm456_vm8 = vweird.f32 %v729_v30 }
 0xbec   :  { %vm457_vm10 = vmor %vm455_vm9, %vm456_vm8 }
 0xbed   :  { %v452_v32 = vsub.f32 1.0, %v451_v31 }
 0xbef   :  { %v453_v33 = vmul.f32 %v729_v30, %v452_v32 }
 0xbf1   :  { %v454_v34 = vadd.f32 %v729_v30, %v453_v33 }
 0xbf3   :  { %v458_v37 = vsel %vm457_vm10, %v729_v30, %v454_v34 }
 0xbf4   :  { %v463_v40 = vsel %vm460_vm11, %v462_v38, %v458_v37 }
 0xbf5   :  { %v477_v45 = vsub.f32 1.0, %v463_v40  ;;  %v483_v47 = vmul.f32 %v463_v40, %v414_v21 }
 0xc4b   :  { %v468_v39 = vpop.permute.xlu1 %467 }
 0xc4c   :  { %v470_v41 = vmul.f32 %v468_v39, %v463_v40 }
 0xc4e   :  { %472 = vrot.lane.b32.xlu2 %v470_v41, %s855_s29 }
 0xca8   :  { %v473_v42 = vpop.permute.xlu2 %472 }
 0xca9   :  { %v475_v43 = vadd.f32 %v473_v42, %v422_v25 }
 0xcab   :  { %730 = vtanh.f32 %v475_v43 }
 0xcb1   :  { %v731_v44 = vpop.eup %730 }
 0xcb2   :  { %479 = vrot.lane.b32.xlu0 %v731_v44, %s856_s2 }
 0xd24   :  { %v480_v46 = vpop.permute.xlu0 %479 }
 0xd25   :  { %v482_v48 = vmul.f32 %v480_v46, %v477_v45 }
 0xd27   :  { %v484_v49 = vadd.f32 %v483_v47, %v482_v48 }
 0xd29   :  { %486 = vrot.lane.b32.xlu1 %v484_v49, %s856_s2 }
 0xd9b   :  { %v487_v50 = vpop.permute.xlu1 %486 }
 0xd9c   :  { %490 = vst.msk [vmem:[#allocation7 + $0xa] sm:$0x3] %vm54_vm0, %v487_v50  ;;  %680 = vmatmul.msk.f32.vlgmr.msrb.gmra.mxu2 %vm63_vm1, %v487_v50 }
 0xe1f   :  { %v512_v51 = vpop.f32.mrf.mxu2 }
 0xe20   :  { %v535_v52 = vadd.f32 %v512_v51, %v900_v7  ;;  %v515_v54 = vadd.f32 %v512_v51, %v492_v53 }
 0xe22   :  { %537 = vrot.lane.b32.xlu2 %v535_v52, %s855_s29  ;;  %v681_v55 = vmul.f32 -1.442695, %v515_v54 }
 0xe24   :  { %732 = vpow2.f32 %v681_v55 }
 0xe2a   :  { %v733_v56 = vpop.eup %732 }
 0xe2b   :  { %v519_v57 = vadd.f32 1.0, %v733_v56 }
 0xe2d   :  { %734 = vrcp.f32 %v519_v57  ;;  %v531_v63 = vand.u32 2147483648, %v519_v57  ;;  %vm525_vm13 = vweird.f32 %v519_v57  ;;  %v529_v0 = vand.u32 2147483647, %v519_v57 }
 0xe2f   :  { %v532_v2 = vor.u32 1.1754944e-38, %v531_v63  ;;  %vm530_vm15 = vcmp.eq.f32.partialorder %v529_v0, 8.507059e+37 }
 0xe33   :  { %v735_v58 = vpop.eup %734 }
 0xe34   :  { %v521_v59 = vmul.f32 %v735_v58, %v519_v57  ;;  %vm526_vm12 = vweird.f32 %v735_v58 }
 0xe35   :  { %vm527_vm14 = vmor %vm525_vm13, %vm526_vm12 }
 0xe36   :  { %v522_v60 = vsub.f32 1.0, %v521_v59 }
 0xe38   :  { %v523_v61 = vmul.f32 %v735_v58, %v522_v60 }
 0xe3a   :  { %v524_v62 = vadd.f32 %v735_v58, %v523_v61 }
 0xe3c   :  { %v528_v1 = vsel %vm527_vm14, %v735_v58, %v524_v62 }
 0xe3d   :  { %v533_v4 = vsel %vm530_vm15, %v532_v2, %v528_v1 }
 0xe3e   :  { %v547_v10 = vsub.f32 1.0, %v533_v4  ;;  %v553_v12 = vmul.f32 %v533_v4, %v484_v49 }
 0xe7c   :  { %v538_v3 = vpop.permute.xlu2 %537 }
 0xe7d   :  { %v540_v5 = vmul.f32 %v538_v3, %v533_v4 }
 0xe7f   :  { %542 = vrot.lane.b32.xlu0 %v540_v5, %s855_s29 }
 0xef1   :  { %v543_v6 = vpop.permute.xlu0 %542 }
 0xef2   :  { %v545_v8 = vadd.f32 %v543_v6, %v492_v53 }
 0xef4   :  { %736 = vtanh.f32 %v545_v8 }
 0xefa   :  { %v737_v9 = vpop.eup %736 }
 0xefb   :  { %549 = vrot.lane.b32.xlu1 %v737_v9, %s856_s2 }
 0xf6d   :  { %v550_v11 = vpop.permute.xlu1 %549 }
 0xf6e   :  { %v552_v13 = vmul.f32 %v550_v11, %v547_v10 }
 0xf70   :  { %v554_v14 = vadd.f32 %v553_v12, %v552_v13 }
 0xf72   :  { %556 = vrot.lane.b32.xlu2 %v554_v14, %s856_s2 }
 0xfcc   :  { %v557_v15 = vpop.permute.xlu2 %556 }
 0xfcd   :  { %560 = vst.msk [vmem:[#allocation7 + $0xc] sm:$0x3] %vm54_vm0, %v557_v15  ;;  %682 = vmatmul.msk.f32.vlgmr.msrb.gmra.mxu3 %vm63_vm1, %v557_v15 }
0x1050   :  { %v582_v16 = vpop.f32.mrf.mxu3 }
0x1051   :  { %v605_v17 = vadd.f32 %v582_v16, %v900_v7  ;;  %v585_v19 = vadd.f32 %v582_v16, %v562_v18 }
0x1053   :  { %607 = vrot.lane.b32.xlu0 %v605_v17, %s855_s29  ;;  %v683_v20 = vmul.f32 -1.442695, %v585_v19 }
0x1055   :  { %738 = vpow2.f32 %v683_v20 }
0x105b   :  { %v739_v21 = vpop.eup %738 }
0x105c   :  { %v589_v22 = vadd.f32 1.0, %v739_v21 }
0x105e   :  { %740 = vrcp.f32 %v589_v22  ;;  %v601_v28 = vand.u32 2147483648, %v589_v22  ;;  %vm595_vm1 = vweird.f32 %v589_v22  ;;  %v599_v29 = vand.u32 2147483647, %v589_v22 }
0x1060   :  { %v602_v30 = vor.u32 1.1754944e-38, %v601_v28  ;;  %vm600_vm4 = vcmp.eq.f32.partialorder %v599_v29, 8.507059e+37 }
0x1064   :  { %v741_v23 = vpop.eup %740 }
0x1065   :  { %v591_v24 = vmul.f32 %v741_v23, %v589_v22  ;;  %vm596_vm2 = vweird.f32 %v741_v23 }
0x1066   :  { %vm597_vm3 = vmor %vm595_vm1, %vm596_vm2 }
0x1067   :  { %v592_v25 = vsub.f32 1.0, %v591_v24 }
0x1069   :  { %v593_v26 = vmul.f32 %v741_v23, %v592_v25 }
0x106b   :  { %v594_v27 = vadd.f32 %v741_v23, %v593_v26 }
0x106d   :  { %v598_v7 = vsel %vm597_vm3, %v741_v23, %v594_v27 }
0x106e   :  { %v603_v32 = vsel %vm600_vm4, %v602_v30, %v598_v7 }
0x106f   :  { %v617_v37 = vsub.f32 1.0, %v603_v32  ;;  %v623_v39 = vmul.f32 %v603_v32, %v554_v14 }
0x10c5   :  { %v608_v31 = vpop.permute.xlu0 %607 }
0x10c6   :  { %v610_v33 = vmul.f32 %v608_v31, %v603_v32 }
0x10c8   :  { %612 = vrot.lane.b32.xlu1 %v610_v33, %s855_s29 }
0x113a   :  { %v613_v34 = vpop.permute.xlu1 %612 }
0x113b   :  { %v615_v35 = vadd.f32 %v613_v34, %v562_v18 }
0x113d   :  { %742 = vtanh.f32 %v615_v35 }
0x1143   :  { %v743_v36 = vpop.eup %742 }
0x1144   :  { %619 = vrot.lane.b32.xlu2 %v743_v36, %s856_s2 }
0x119e   :  { %v620_v38 = vpop.permute.xlu2 %619 }
0x119f   :  { %v622_v40 = vmul.f32 %v620_v38, %v617_v37 }
0x11a1   :  { %v624_v41 = vadd.f32 %v623_v39, %v622_v40 }
0x11a3   :  { %626 = vrot.lane.b32.xlu0 %v624_v41, %s856_s2 }
0x1215   :  { %v627_v42 = vpop.permute.xlu0 %626 }
0x1216   :  { %630 = vst.msk [vmem:[#allocation7 + $0xe] sm:$0x3] %vm54_vm0, %v627_v42 }
0x1217   :  { %631 = vst.msk [vmem:[#allocation8] sm:$0x3] %vm54_vm0, %v627_v42  ;;  %644 = dma.vmem_to_hbm [thread:$0]  %s637_s5, 256, %s639_s8, [#allocation4], %s849_s23, %s849_s23, %s850_s24  }
0x1218   :  { %655 = dma.vmem_to_hbm [thread:$0]  %s651_s10, 32, %s653_s13, [#allocation9]  }
0x1219   :  { %844 = dma.done.wait [#allocation4], 256  }
0x121a   :  { %845 = vsyncadd [#allocation4], 4294967040 }
0x121b   :  { %846 = dma.done.wait [#allocation9], 32  }
0x121c   :  { %847 = vsyncadd [#allocation9], 4294967264 }
0x121d   :  { %664 = vsyncpa [#allocation3], 1 }
0x121e   :  { %665 = vsyncpa [#allocation6], 1 }
0x121f   :  { %666 = vsyncpa [#allocation4], 1 }
0x1220   :  { %667 = vsyncpa [#allocation9], 1 }

</bundles_post_ra>
